<compile_context>
chip_gen: v7x
topology: tpu7x:2x2x1
jax: 0.10.0
libtpu: 0.0.40
codegen_flags: <defaults>
</compile_context>

<pallas_src>
import jax
import jax.numpy as jnp
from jax.experimental import pallas as pl
from jax.experimental.pallas import tpu as pltpu

IN_FEATURES = 3
OUT_FEATURES = 3
AUG = IN_FEATURES + 1  # contraction length with the bias lane folded in


def linear_kernel(x_ref, w_ref, o_ref):
    # x_ref: (AUG, 1)    augmented input column [x_0, x_1, x_2, 1.0]
    # w_ref: (AUG, OUT)  augmented weight [W^T ; b] (packed once at init)
    # o_ref: (1, OUT)    lane-oriented output row
    prod = w_ref[...] * x_ref[...]                       # VPU broadcast-multiply
    o_ref[...] = jnp.sum(prod, axis=0, keepdims=True).astype(o_ref.dtype)  # XLU sublane reduce


@jax.jit
def linear_pallas(x, w_aug):
    """x: (IN,) f32, w_aug: (IN+1, OUT) f32 (packed [W^T ; b])."""
    # Per-call work kept minimal: append the constant bias lane and view as a
    # column; the output reshape from (1, OUT) is a free row-major view.
    x_aug = jnp.concatenate([x, jnp.ones((1,), x.dtype)]).reshape(AUG, 1)

    out = pl.pallas_call(
        linear_kernel,
        out_shape=jax.ShapeDtypeStruct((1, OUT_FEATURES), jnp.float32),
        in_specs=[
            pl.BlockSpec(memory_space=pltpu.MemorySpace.VMEM),
            pl.BlockSpec(memory_space=pltpu.MemorySpace.VMEM),
        ],
        out_specs=pl.BlockSpec(memory_space=pltpu.MemorySpace.VMEM),
        cost_estimate=pl.CostEstimate(
            flops=2 * OUT_FEATURES * AUG,
            transcendentals=0,
            bytes_accessed=4 * (AUG + AUG * OUT_FEATURES + OUT_FEATURES),
        ),
    )(x_aug, w_aug)
    return out.reshape(OUT_FEATURES)


def init_params(key):
    # Deterministic init mimicking nn.Linear's uniform(-1/sqrt(in), 1/sqrt(in)).
    kw, kb = jax.random.split(key)
    bound = 1.0 / jnp.sqrt(jnp.float32(IN_FEATURES))
    weight = jax.random.uniform(
        kw, (OUT_FEATURES, IN_FEATURES), jnp.float32, -bound, bound
    )
    bias = jax.random.uniform(kb, (OUT_FEATURES,), jnp.float32, -bound, bound)
    return weight, bias


def pack_params(weight, bias):
    """One-time layout hoist: augmented (IN+1, OUT) matrix [W^T ; b]."""
    return jnp.concatenate([weight.T, bias[None, :]], axis=0)


if __name__ == "__main__":
    key = jax.random.PRNGKey(0)
    k_in, k_param = jax.random.split(key)

    x = jax.random.normal(k_in, (IN_FEATURES,), dtype=jnp.float32)
    weight, bias = init_params(k_param)
    w_aug = pack_params(weight, bias)  # static, built once

    y = linear_pallas(x, w_aug)
    jax.block_until_ready(y)

    # Reference check against plain JAX (same semantics as torch.nn.Linear).
    y_ref = x @ weight.T + bias
    assert y.shape == (OUT_FEATURES,)
    assert jnp.allclose(y, y_ref, atol=1e-5, rtol=1e-5)

    print("KERNEL_OK")
</pallas_src>

<mosaic_0001>
module attributes {stable_mosaic.version = 11 : i64} {
  func.func @linear_kernel(%arg0: memref<4x1xf32, #tpu.memory_space<vmem>>, %arg1: memref<4x3xf32, #tpu.memory_space<vmem>>, %arg2: memref<1x3xf32, #tpu.memory_space<vmem>>) attributes {dimension_semantics = [], scalar_prefetch = 0 : i64, scratch_operands = 0 : i64, tpu.core_type = #tpu.core_type<tc>} {
    %c0 = arith.constant 0 : index
    %c0_0 = arith.constant 0 : index
    %0 = vector.load %arg1[%c0, %c0_0] : memref<4x3xf32, #tpu.memory_space<vmem>>, vector<4x3xf32>
    %c0_1 = arith.constant 0 : index
    %c0_2 = arith.constant 0 : index
    %1 = vector.load %arg0[%c0_1, %c0_2] : memref<4x1xf32, #tpu.memory_space<vmem>>, vector<4x1xf32>
    %2 = vector.broadcast %1 : vector<4x1xf32> to vector<4x3xf32>
    %3 = arith.mulf %0, %2 : vector<4x3xf32>
    %cst = arith.constant dense<0.000000e+00> : vector<3xf32>
    %4 = vector.multi_reduction <add>, %3, %cst [0] : vector<4x3xf32> to vector<3xf32>
    %5 = vector.shape_cast %4 : vector<3xf32> to vector<1x3xf32>
    %c0_3 = arith.constant 0 : index
    %c0_4 = arith.constant 0 : index
    %6 = vector.load %arg2[%c0_3, %c0_4] : memref<1x3xf32, #tpu.memory_space<vmem>>, vector<1x3xf32>
    tpu.vector_store %arg2[%c0_3, %c0_4], %5 {strides = array<i32>} : memref<1x3xf32, #tpu.memory_space<vmem>>, vector<1x3xf32>,
    return
  }
}

</mosaic_0001>

<bundles_post_ra>
// kernel: linear_pallas.1
= control target key start
LH: loop header
LB: loop body
LE: loop exit
PB: predicated region body
PF: predicated region fallthrough
CT: control target
= control target key end

     0   :  { %s106_s0 = inlined_call_operand.vmem [shape: f32[4,1], index: 0, kind: input, shape index: {}]   ;;  %s107_s1 = inlined_call_operand.vmem [shape: f32[4,3], index: 1, kind: input, shape index: {}]   ;;  %s108_s2 = inlined_call_operand.hbm [shape: f32[1,3], index: 2, kind: output, shape index: {}]  }
   0x1   :  { %v13_v0 = vld [vmem:[%s106_s0] sm:$0xf] }
   0x2   :  { %7 = vsyncpa [#allocation3], 0  ;;  %v71_v1 = vmov 0   ;;  %v12_v2 = vld [vmem:[%s107_s1] sm:$0xf]  ;;  %vm20_vm0 = vcmask 19456  }
   0x3   :  { %46 = vset.pattern.permute.xlu0 %v71_v1  ;;  %s72_s13 = smov [#allocation2]   ;;  %vm28_vm1 = vcmask 16384  }
   0x4   :  { %16 = vperm.xlu0 %46, %v13_v0   ;;  %s36_s14 = sshll.u32 %s72_s13, 4  ;;  %s37_s14 = int_to_ptr.vmem [resolvable:$true] %s36_s14 }
   0x5   :  { %s47_s0 = scalar_lea.vmem %s37_s14, 16  ;;  %s51_s15 = scalar_lea.vmem %s37_s14, 32 }
   0x6   :  { %p48_p0 = scmp.ne.s32.totalorder %s37_s14, %s47_s0  ;;  %p52_p1 = scmp.lt.s32.totalorder %s37_s14, %s37_s14 }
   0x7   :  { %p53_p2 = scmp.lt.s32.totalorder %s51_s15, %s47_s0 }
   0x9   :  { %p54_p3 = por %p53_p2, %p52_p1 }
   0xb   :  { %p55_p4 = pnand %p54_p3, %p48_p0 }
  0x83   :  { %v17_v3 = vpop.permute.xlu0 %16 }
  0x84   :  { %v19_v4 = vmul.f32 %v17_v3, %v12_v2 }
  0x86   :  { %v21_v5 = vsel %vm20_vm0, %v19_v4, 0.0 }
  0x87   :  { %v22_v6 = vrot.slane %v21_v5, 4 }
  0x89   :  { %v23_v7 = vadd.f32 %v22_v6, %v21_v5 }
  0x8b   :  { %v24_v8 = vrot.slane %v23_v7, 2 }
  0x8d   :  { %v25_v9 = vadd.f32 %v24_v8, %v23_v7 }
  0x8f   :  { %v26_v10 = vrot.slane %v25_v9, 1 }
  0x91   :  { %v27_v11 = vadd.f32 %v26_v10, %v25_v9 }
  0x93   :  { %29 = vst.msk [vmem:[#allocation2] sm:$0x1] %vm28_vm1, %v27_v11 }
  0x94   :  { %58 = shalt.err (!%p55_p4)
}
  0x95   :  { %s59_s17 = scalar_lea.hbm %s108_s2, 16 }
  0x96   :  { %p60_p5 = scmp.ne.s32.totalorder %s108_s2, %s59_s17  ;;  %p63_p6 = scmp.lt.u32.totalorder %s59_s17, %s108_s2 }
  0x98   :  { %p65_p7 = pnand %p63_p6, %p60_p5 }
  0x9a   :  { %68 = shalt.err (!%p65_p7)
}
  0x9b   :  { %39 = dma.vmem_to_hbm [thread:$0]  %s37_s14, 16, %s108_s2, [#allocation3]  }
  0x9c   :  { %69 = dma.done.wait [#allocation3], 16  }
  0x9d   :  { %70 = vsyncadd [#allocation3], 4294967280 }
  0x9e   :  { %43 = vsyncpa [#allocation3], 1 }

</bundles_post_ra>
